<compile_context>
chip_gen: v7x
topology: tpu7x:2x2x1
jax: 0.10.0
libtpu: 0.0.40
codegen_flags: <defaults>
</compile_context>

<pallas_src>
import functools

import jax
import jax.numpy as jnp
from jax.experimental import pallas as pl
from jax.experimental.pallas import tpu as pltpu


def dense_layer_kernel(x_ref, scale_ref, shift_ref, w_ref, mask_ref, o_ref,
                       *, H, W):
    """Fused BN(scale/shift) + ReLU + 3x3 SAME conv for one image.

    x_ref    : (1, Cin, H*W)     input slab (one batch element, NCHW-flattened)
    scale_ref: (Cin, 1)          folded BN scale  (gamma / sqrt(var + eps))
    shift_ref: (Cin, 1)          folded BN shift  (beta - mean * scale)
    w_ref    : (Cout, 9*Cin)     conv weights, rows = (dy, dx, cin)-major
    mask_ref : (9, H*W)          0/1 border-validity mask per tap (dy*3+dx)
    o_ref    : (1, Cout, H*W)    output slab (NCHW-flattened, lane-dense)
    """
    HW = H * W

    x = x_ref[0]                                       # (Cin, HW), lanes = HW
    # Folded BatchNorm + ReLU: per-sublane affine over fully packed lanes.
    y = jnp.maximum(x * scale_ref[...] + shift_ref[...], 0.0)

    masks = mask_ref[...]                              # (9, HW) in {0, 1}

    # im2col: 9 shifted copies of y.  Each shift by (oy, ox) is a lane
    # rotation by oy*W + ox (XLU, cheap) followed by one vmul against the
    # precomputed border mask for that tap.  Taps stack on the contraction
    # axis; the whole conv is then a single MXU matmul.
    taps = []
    for dy in range(3):
        for dx in range(3):
            oy, ox = dy - 1, dx - 1
            s = oy * W + ox                            # flat lane shift
            shifted = y if s == 0 else pltpu.roll(y, shift=(-s) % HW, axis=1)
            if oy == 0 and ox == 0:
                taps.append(shifted)                   # center tap needs no mask
            else:
                taps.append(shifted * masks[dy * 3 + dx])
    patches = jnp.concatenate(taps, axis=0)            # (9*Cin, HW)

    # Single MXU matmul: (Cout, 9*Cin) @ (9*Cin, HW) -> lane-dense (Cout, HW).
    out = jnp.dot(w_ref[...], patches, preferred_element_type=jnp.float32)

    # Dropout(0.2): identity in eval mode.
    o_ref[0] = out.astype(o_ref.dtype)


@jax.jit
def dense_layer_forward(x_nchw, gamma, beta, running_mean, running_var, w_oihw,
                        eps=1e-5):
    """NCHW torch convention in/out; (C, H*W) lane-major inside the kernel."""
    N, Cin, H, W = x_nchw.shape
    Cout = w_oihw.shape[0]
    HW = H * W

    # Fold BN running stats into a per-channel affine (glue, plain JAX).
    scale = (gamma / jnp.sqrt(running_var + eps)).astype(jnp.float32)   # (Cin,)
    shift = (beta - running_mean * scale).astype(jnp.float32)           # (Cin,)
    scale2d = scale.reshape(Cin, 1)
    shift2d = shift.reshape(Cin, 1)

    # Pure reshapes of NCHW (no HBM transpose of the activations).
    x_flat = x_nchw.reshape(N, Cin, HW).astype(jnp.float32)
    # OIHW -> (Cout, dy, dx, Cin) -> (Cout, 9*Cin); row order matches the
    # tap/concat order in the kernel.
    w2 = jnp.transpose(w_oihw, (0, 2, 3, 1)).reshape(Cout, 9 * Cin)
    w2 = w2.astype(jnp.float32)

    # Precompute the 9 border-validity masks once (tap order dy-major,
    # dx-minor).  They are image-independent, live resident in VMEM across the
    # whole grid, and turn per-tap border handling into a single vmul.
    pos = jnp.arange(HW, dtype=jnp.int32)
    row = pos // W
    col = pos % W
    mask_list = []
    for dy in range(3):
        for dx in range(3):
            oy, ox = dy - 1, dx - 1
            valid = ((row + oy >= 0) & (row + oy < H) &
                     (col + ox >= 0) & (col + ox < W))
            mask_list.append(valid)
    mask9 = jnp.stack(mask_list, axis=0).astype(jnp.float32)            # (9, HW)

    kernel = functools.partial(dense_layer_kernel, H=H, W=W)

    out_flat = pl.pallas_call(
        kernel,
        out_shape=jax.ShapeDtypeStruct((N, Cout, HW), jnp.float32),
        grid=(N,),
        in_specs=[
            pl.BlockSpec((1, Cin, HW), lambda n: (n, 0, 0)),     # streams per image
            pl.BlockSpec((Cin, 1), lambda n: (0, 0)),            # resident
            pl.BlockSpec((Cin, 1), lambda n: (0, 0)),            # resident
            pl.BlockSpec((Cout, 9 * Cin), lambda n: (0, 0)),     # resident
            pl.BlockSpec((9, HW), lambda n: (0, 0)),             # resident
        ],
        out_specs=pl.BlockSpec((1, Cout, HW), lambda n: (n, 0, 0)),
        compiler_params=pltpu.CompilerParams(
            dimension_semantics=("parallel",)),
    )(x_flat, scale2d, shift2d, w2, mask9)

    return out_flat.reshape(N, Cout, H, W)  # flattened-NCHW -> NCHW (free)


def reference_forward(x_nchw, gamma, beta, running_mean, running_var, w_oihw,
                      eps=1e-5):
    """Pure-JAX reference (eval-mode BN, ReLU, SAME 3x3 conv, eval dropout)."""
    scale = gamma / jnp.sqrt(running_var + eps)
    shift = beta - running_mean * scale
    y = x_nchw * scale[None, :, None, None] + shift[None, :, None, None]
    y = jnp.maximum(y, 0.0)
    out = jax.lax.conv_general_dilated(
        y, w_oihw, window_strides=(1, 1), padding="SAME",
        dimension_numbers=("NCHW", "OIHW", "NCHW"))
    return out


if __name__ == "__main__":
    # Small shapes consistent with the module: Conv2d(in_channels, out_channels, 3)
    N, Cin, Cout, H, W = 2, 4, 8, 16, 16

    key = jax.random.PRNGKey(0)
    kx, kg, kb, km, kv, kw = jax.random.split(key, 6)

    x = jax.random.normal(kx, (N, Cin, H, W), dtype=jnp.float32)

    # Deterministic "parameters" matching the module's __init__ shapes.
    gamma = jax.random.normal(kg, (Cin,), dtype=jnp.float32) * 0.1 + 1.0
    beta = jax.random.normal(kb, (Cin,), dtype=jnp.float32) * 0.1
    running_mean = jax.random.normal(km, (Cin,), dtype=jnp.float32) * 0.1
    running_var = jax.random.uniform(kv, (Cin,), dtype=jnp.float32,
                                     minval=0.5, maxval=1.5)
    w = jax.random.normal(kw, (Cout, Cin, 3, 3), dtype=jnp.float32) * 0.1

    out = dense_layer_forward(x, gamma, beta, running_mean, running_var, w)
    out = jax.block_until_ready(out)

    ref = reference_forward(x, gamma, beta, running_mean, running_var, w)
    ref = jax.block_until_ready(ref)

    assert out.shape == (N, Cout, H, W), out.shape
    assert jnp.allclose(out, ref, atol=1e-4, rtol=1e-4), (
        float(jnp.max(jnp.abs(out - ref))))

    print("KERNEL_OK")
</pallas_src>

<mosaic_0001>
module attributes {stable_mosaic.version = 11 : i64} {
  func.func @dense_layer_kernel(%arg0: i32, %arg1: memref<1x4x256xf32, #tpu.memory_space<vmem>>, %arg2: memref<4x1xf32, #tpu.memory_space<vmem>>, %arg3: memref<4x1xf32, #tpu.memory_space<vmem>>, %arg4: memref<8x36xf32, #tpu.memory_space<vmem>>, %arg5: memref<9x256xf32, #tpu.memory_space<vmem>>, %arg6: memref<1x8x256xf32, #tpu.memory_space<vmem>>) attributes {dimension_semantics = [#tpu.dimension_semantics<parallel>], iteration_bounds = array<i64: 2>, scalar_prefetch = 0 : i64, scratch_operands = 0 : i64, tpu.core_type = #tpu.core_type<tc>, window_params = [{transform_indices = @transform_0, window_bounds = array<i64: 1, 4, 256>}, {pipeline_mode = #tpu.pipeline_mode<synchronous>, transform_indices = @transform_1, window_bounds = array<i64: 4, 1>}, {pipeline_mode = #tpu.pipeline_mode<synchronous>, transform_indices = @transform_2, window_bounds = array<i64: 4, 1>}, {pipeline_mode = #tpu.pipeline_mode<synchronous>, transform_indices = @transform_3, window_bounds = array<i64: 8, 36>}, {pipeline_mode = #tpu.pipeline_mode<synchronous>, transform_indices = @transform_4, window_bounds = array<i64: 9, 256>}, {transform_indices = @transform_5, window_bounds = array<i64: 1, 8, 256>}]} {
    %c0 = arith.constant 0 : index
    %c0_0 = arith.constant 0 : index
    %c0_1 = arith.constant 0 : index
    %0 = vector.load %arg1[%c0, %c0_0, %c0_1] : memref<1x4x256xf32, #tpu.memory_space<vmem>>, vector<1x4x256xf32>
    %1 = vector.shape_cast %0 : vector<1x4x256xf32> to vector<4x256xf32>
    %c0_2 = arith.constant 0 : index
    %c0_3 = arith.constant 0 : index
    %2 = vector.load %arg2[%c0_2, %c0_3] : memref<4x1xf32, #tpu.memory_space<vmem>>, vector<4x1xf32>
    %3 = vector.broadcast %2 : vector<4x1xf32> to vector<4x256xf32>
    %4 = arith.mulf %1, %3 : vector<4x256xf32>
    %c0_4 = arith.constant 0 : index
    %c0_5 = arith.constant 0 : index
    %5 = vector.load %arg3[%c0_4, %c0_5] : memref<4x1xf32, #tpu.memory_space<vmem>>, vector<4x1xf32>
    %6 = vector.broadcast %5 : vector<4x1xf32> to vector<4x256xf32>
    %7 = arith.addf %4, %6 : vector<4x256xf32>
    %cst = arith.constant 0.000000e+00 : f32
    %8 = vector.broadcast %cst : f32 to vector<4x256xf32>
    %9 = arith.maximumf %7, %8 : vector<4x256xf32>
    %c0_6 = arith.constant 0 : index
    %c0_7 = arith.constant 0 : index
    %10 = vector.load %arg5[%c0_6, %c0_7] : memref<9x256xf32, #tpu.memory_space<vmem>>, vector<9x256xf32>
    %c17_i32 = arith.constant 17 : i32
    %11 = tpu.dynamic_rotate %9 by %c17_i32 dim 1 : vector<4x256xf32>, i32 -> vector<4x256xf32>
    %12 = vector.extract_strided_slice %10 {offsets = [0, 0], sizes = [1, 256], strides = [1, 1]} : vector<9x256xf32> to vector<1x256xf32>
    %13 = vector.shape_cast %12 : vector<1x256xf32> to vector<256xf32>
    %14 = vector.shape_cast %13 : vector<256xf32> to vector<1x256xf32>
    %15 = vector.broadcast %14 : vector<1x256xf32> to vector<4x256xf32>
    %16 = arith.mulf %11, %15 : vector<4x256xf32>
    %c16_i32 = arith.constant 16 : i32
    %17 = tpu.dynamic_rotate %9 by %c16_i32 dim 1 : vector<4x256xf32>, i32 -> vector<4x256xf32>
    %18 = vector.extract_strided_slice %10 {offsets = [1, 0], sizes = [1, 256], strides = [1, 1]} : vector<9x256xf32> to vector<1x256xf32>
    %19 = vector.shape_cast %18 : vector<1x256xf32> to vector<256xf32>
    %20 = vector.shape_cast %19 : vector<256xf32> to vector<1x256xf32>
    %21 = vector.broadcast %20 : vector<1x256xf32> to vector<4x256xf32>
    %22 = arith.mulf %17, %21 : vector<4x256xf32>
    %c15_i32 = arith.constant 15 : i32
    %23 = tpu.dynamic_rotate %9 by %c15_i32 dim 1 : vector<4x256xf32>, i32 -> vector<4x256xf32>
    %24 = vector.extract_strided_slice %10 {offsets = [2, 0], sizes = [1, 256], strides = [1, 1]} : vector<9x256xf32> to vector<1x256xf32>
    %25 = vector.shape_cast %24 : vector<1x256xf32> to vector<256xf32>
    %26 = vector.shape_cast %25 : vector<256xf32> to vector<1x256xf32>
    %27 = vector.broadcast %26 : vector<1x256xf32> to vector<4x256xf32>
    %28 = arith.mulf %23, %27 : vector<4x256xf32>
    %c1_i32 = arith.constant 1 : i32
    %29 = tpu.dynamic_rotate %9 by %c1_i32 dim 1 : vector<4x256xf32>, i32 -> vector<4x256xf32>
    %30 = vector.extract_strided_slice %10 {offsets = [3, 0], sizes = [1, 256], strides = [1, 1]} : vector<9x256xf32> to vector<1x256xf32>
    %31 = vector.shape_cast %30 : vector<1x256xf32> to vector<256xf32>
    %32 = vector.shape_cast %31 : vector<256xf32> to vector<1x256xf32>
    %33 = vector.broadcast %32 : vector<1x256xf32> to vector<4x256xf32>
    %34 = arith.mulf %29, %33 : vector<4x256xf32>
    %c255_i32 = arith.constant 255 : i32
    %35 = tpu.dynamic_rotate %9 by %c255_i32 dim 1 : vector<4x256xf32>, i32 -> vector<4x256xf32>
    %36 = vector.extract_strided_slice %10 {offsets = [5, 0], sizes = [1, 256], strides = [1, 1]} : vector<9x256xf32> to vector<1x256xf32>
    %37 = vector.shape_cast %36 : vector<1x256xf32> to vector<256xf32>
    %38 = vector.shape_cast %37 : vector<256xf32> to vector<1x256xf32>
    %39 = vector.broadcast %38 : vector<1x256xf32> to vector<4x256xf32>
    %40 = arith.mulf %35, %39 : vector<4x256xf32>
    %c241_i32 = arith.constant 241 : i32
    %41 = tpu.dynamic_rotate %9 by %c241_i32 dim 1 : vector<4x256xf32>, i32 -> vector<4x256xf32>
    %42 = vector.extract_strided_slice %10 {offsets = [6, 0], sizes = [1, 256], strides = [1, 1]} : vector<9x256xf32> to vector<1x256xf32>
    %43 = vector.shape_cast %42 : vector<1x256xf32> to vector<256xf32>
    %44 = vector.shape_cast %43 : vector<256xf32> to vector<1x256xf32>
    %45 = vector.broadcast %44 : vector<1x256xf32> to vector<4x256xf32>
    %46 = arith.mulf %41, %45 : vector<4x256xf32>
    %c240_i32 = arith.constant 240 : i32
    %47 = tpu.dynamic_rotate %9 by %c240_i32 dim 1 : vector<4x256xf32>, i32 -> vector<4x256xf32>
    %48 = vector.extract_strided_slice %10 {offsets = [7, 0], sizes = [1, 256], strides = [1, 1]} : vector<9x256xf32> to vector<1x256xf32>
    %49 = vector.shape_cast %48 : vector<1x256xf32> to vector<256xf32>
    %50 = vector.shape_cast %49 : vector<256xf32> to vector<1x256xf32>
    %51 = vector.broadcast %50 : vector<1x256xf32> to vector<4x256xf32>
    %52 = arith.mulf %47, %51 : vector<4x256xf32>
    %c239_i32 = arith.constant 239 : i32
    %53 = tpu.dynamic_rotate %9 by %c239_i32 dim 1 : vector<4x256xf32>, i32 -> vector<4x256xf32>
    %54 = vector.extract_strided_slice %10 {offsets = [8, 0], sizes = [1, 256], strides = [1, 1]} : vector<9x256xf32> to vector<1x256xf32>
    %55 = vector.shape_cast %54 : vector<1x256xf32> to vector<256xf32>
    %56 = vector.shape_cast %55 : vector<256xf32> to vector<1x256xf32>
    %57 = vector.broadcast %56 : vector<1x256xf32> to vector<4x256xf32>
    %58 = arith.mulf %53, %57 : vector<4x256xf32>
    %59 = tpu.concatenate %16, %22, %28, %34, %9, %40, %46, %52, %58 in 0 : vector<4x256xf32>, vector<4x256xf32>, vector<4x256xf32>, vector<4x256xf32>, vector<4x256xf32>, vector<4x256xf32>, vector<4x256xf32>, vector<4x256xf32>, vector<4x256xf32> -> vector<36x256xf32>
    %c0_8 = arith.constant 0 : index
    %c0_9 = arith.constant 0 : index
    %60 = vector.load %arg4[%c0_8, %c0_9] : memref<8x36xf32, #tpu.memory_space<vmem>>, vector<8x36xf32>
    %cst_10 = arith.constant dense<0.000000e+00> : vector<8x256xf32>
    %61 = tpu.matmul %60, %59, %cst_10 {dimension_numbers = #tpu.dot_dimension_numbers<[1], [0], [0], [1], [0, 0, 1, 1], [], []>} : vector<8x36xf32>, vector<36x256xf32>, vector<8x256xf32> -> vector<8x256xf32>
    %c0_11 = arith.constant 0 : index
    %c0_12 = arith.constant 0 : index
    %c0_13 = arith.constant 0 : index
    %62 = vector.load %arg6[%c0_11, %c0_12, %c0_13] : memref<1x8x256xf32, #tpu.memory_space<vmem>>, vector<1x8x256xf32>
    %63 = vector.shape_cast %62 : vector<1x8x256xf32> to vector<8x256xf32>
    %64 = vector.shape_cast %61 : vector<8x256xf32> to vector<1x8x256xf32>
    tpu.vector_store %arg6[%c0_11, %c0_12, %c0_13], %64 {strides = array<i32>} : memref<1x8x256xf32, #tpu.memory_space<vmem>>, vector<1x8x256xf32>,
    return
  }
  func.func @transform_0(%arg0: i32) -> (i32, i32, i32) {
    %c0_i32 = arith.constant 0 : i32
    %c0_i32_0 = arith.constant 0 : i32
    %c0_i32_1 = arith.constant 0 : i32
    return %arg0, %c0_i32, %c0_i32_0 : i32, i32, i32
  }
  func.func @transform_1(%arg0: i32) -> (i32, i32) {
    %c0_i32 = arith.constant 0 : i32
    %c0_i32_0 = arith.constant 0 : i32
    %c0_i32_1 = arith.constant 0 : i32
    return %c0_i32, %c0_i32_0 : i32, i32
  }
  func.func @transform_2(%arg0: i32) -> (i32, i32) {
    %c0_i32 = arith.constant 0 : i32
    %c0_i32_0 = arith.constant 0 : i32
    %c0_i32_1 = arith.constant 0 : i32
    return %c0_i32, %c0_i32_0 : i32, i32
  }
  func.func @transform_3(%arg0: i32) -> (i32, i32) {
    %c0_i32 = arith.constant 0 : i32
    %c0_i32_0 = arith.constant 0 : i32
    %c0_i32_1 = arith.constant 0 : i32
    return %c0_i32, %c0_i32_0 : i32, i32
  }
  func.func @transform_4(%arg0: i32) -> (i32, i32) {
    %c0_i32 = arith.constant 0 : i32
    %c0_i32_0 = arith.constant 0 : i32
    %c0_i32_1 = arith.constant 0 : i32
    return %c0_i32, %c0_i32_0 : i32, i32
  }
  func.func @transform_5(%arg0: i32) -> (i32, i32, i32) {
    %c0_i32 = arith.constant 0 : i32
    %c0_i32_0 = arith.constant 0 : i32
    %c0_i32_1 = arith.constant 0 : i32
    return %arg0, %c0_i32, %c0_i32_0 : i32, i32, i32
  }
}

</mosaic_0001>

<bundles_post_ra>
// kernel: dense_layer_forward.1
= control target key start
LH: loop header
LB: loop body
LE: loop exit
PB: predicated region body
PF: predicated region fallthrough
CT: control target
= control target key end

     0   :  { %s667_s18 = smov 0   ;;  %s793_s0 = inlined_call_operand.vmem [shape: f32[2,4,256], index: 0, kind: input, shape index: {}]   ;;  %s794_s1 = inlined_call_operand.vmem [shape: f32[4,1], index: 1, kind: input, shape index: {}]   ;;  %s795_s2 = inlined_call_operand.vmem [shape: f32[4,1], index: 2, kind: input, shape index: {}]   ;;  %s796_s3 = inlined_call_operand.vmem [shape: f32[8,36], index: 3, kind: input, shape index: {}]   ;;  %s797_s4 = inlined_call_operand.vmem [shape: f32[9,256], index: 4, kind: input, shape index: {}]   ;;  %s798_s5 = inlined_call_operand.vmem [shape: f32[2,8,256], index: 5, kind: output, shape index: {}]  }
   0x1 LB: > { %s572_s19 = sadd.s32 4294967295, %s624_s18   ;;  %p576_p0 = scmp.ge.s32.totalorder %s624_s18, 1  ;;  %s624_s18 = sphi %s667_s18, %s15_s18  }
   0x2   : > { %p187_p1 = scmp.lt.s32.totalorder %s624_s18, 3 }
   0x4   : > { %p188_p2 = pnand %p576_p0, %p187_p1 }
   0x5   : > { %v226_v0 = vld [vmem:[%s794_s1] sm:$0xf] (!%p188_p2)  ;;  %v626_v1 = vmov (!%p188_p2), 0   ;;  %p215_p3 = scmp.lt.s32.totalorder (!%p188_p2), %s572_s19, 1  ;;  %v627_v3 = vmov (!%p188_p2), 839922192   ;;  %v234_v5 = vlaneseq (!%p188_p2) }
   0x6   : > { %191 = sbr.rel (%p188_p2) target bundleno = 514 (0x202), region = 40  ;;  %617 = vset.pattern.permute.xlu0 (!%p188_p2), %v626_v1  ;;  %v240_v2 = vld [vmem:[%s795_s2] sm:$0xf] (!%p188_p2)  ;;  %v232_v4 = vunpack.c.l.s4 (!%p188_p2), %v627_v3  ;;  %s628_s28 = smov (!%p188_p2), 1   ;;  %v636_v18 = vmov (!%p188_p2), 0.0   ;;  %v724_v27 = vld [vmem:[%s797_s4 + $0x8] sm:$0xff] (!%p188_p2) }
   0x7   : > { %229 = vperm.xlu0 (!%p188_p2), %617, %v226_v0   ;;  %v683_v7 = vshrl.u32 (!%p188_p2), %v234_v5, 7  ;;  %s629_s29 = smov (!%p188_p2), 16   ;;  %s630_s30 = smov (!%p188_p2), 17   ;;  %508 = vmatprep.mubr.f32.mxu0 (!%p188_p2), %v636_v18  ;;  %v712_v21 = vand.u32 (!%p188_p2), 127, %v234_v5  ;;  %v719_v26 = vld [vmem:[%s797_s4] sm:$0xff] (!%p188_p2)  ;;  %vm424_vm4 = vcmask (!%p188_p2), 1043456  }
   0x8   : > { %v233_v6 = vunpack.c.0.s8 (!%p188_p2), %v232_v4  ;;  %s631_s6 = smov (!%p188_p2), 15   ;;  %s632_s7 = smov (!%p188_p2), 127   ;;  %vm434_vm9 = vcmask (!%p188_p2), 293888  }
   0x9   : > { %s633_s8 = smov (!%p188_p2), 112   ;;  %s634_s9 = smov (!%p188_p2), 113   ;;  %v290_v24 = vsub.s32 (!%p188_p2), 1, %v683_v7  ;;  %v324_v25 = vsub.s32 (!%p188_p2), 3, %v683_v7  ;;  %vm285_vm0 = vcmp.lt.s32.totalorder (!%p188_p2), %v712_v21, 16  ;;  %vm319_vm1 = vcmp.lt.s32.totalorder (!%p188_p2), %v712_v21, 1 }
   0xa   : > { %v236_v8 = vsub.s32 (!%p188_p2), %v233_v6, %v683_v7  ;;  %s635_s10 = smov (!%p188_p2), 111   ;;  %v273_v30 = vsub.s32 (!%p188_p2), 0, %v683_v7  ;;  %vm268_vm2 = vcmp.lt.s32.totalorder (!%p188_p2), %v712_v21, 17  ;;  %v307_v37 = vsub.s32 (!%p188_p2), 2, %v683_v7 }
   0xb   : > { %243 = vperm.xlu0 (!%p188_p2), %617, %v240_v2   ;;  %v291_v31 = vrot.slane (!%p188_p2), %v719_v26, %v290_v24  ;;  %v295_v32 = vrot.slane (!%p188_p2), %v724_v27, %v290_v24  ;;  %v325_v33 = vrot.slane (!%p188_p2), %v719_v26, %v324_v25  ;;  %v329_v34 = vrot.slane (!%p188_p2), %v724_v27, %v324_v25 }
   0xc   : > { %v274_v40 = vrot.slane (!%p188_p2), %v719_v26, %v273_v30  ;;  %v278_v41 = vrot.slane (!%p188_p2), %v724_v27, %v273_v30  ;;  %vm302_vm3 = vcmp.lt.s32.totalorder (!%p188_p2), %v712_v21, 15  ;;  %v308_v50 = vrot.slane (!%p188_p2), %v719_v26, %v307_v37 }
   0xd   : > { %s800_s19 = smov (!%p215_p3, %s572_s19), 1  ;;  %v312_v51 = vrot.slane %v724_v27, %v307_v37  ;;  %v341_v52 = vsub.s32 5, %v683_v7  ;;  %vm336_vm5 = vcmp.lt.s32.totalorder %v712_v21, 127  ;;  %v375_v56 = vsub.s32 7, %v683_v7 }
   0xe   : > { %s588_s24 = sshll.u32 %s800_s19, 3  ;;  %vm370_vm6 = vcmp.lt.s32.totalorder %v712_v21, 112  ;;  %v358_v18 = vsub.s32 6, %v683_v7  ;;  %vm353_vm7 = vcmp.lt.s32.totalorder %v712_v21, 113  ;;  %vm387_vm8 = vcmp.lt.s32.totalorder %v712_v21, 111  ;;  %s589_s23 = sshll.u32 %s800_s19, 4 }
   0xf   : > { %s219_s27 = scalar_lea.vmem %s793_s0, %s588_s24  ;;  %v342_v1 = vrot.slane %v719_v26, %v341_v52  ;;  %v346_v2 = vrot.slane %v724_v27, %v341_v52  ;;  %s224_s26 = scalar_lea.vmem %s798_s5, %s589_s23 }
  0x10   : > { %v225_v11 = vld [vmem:[%s219_s27] sm:$0xff]  ;;  %v359_v30 = vrot.slane %v719_v26, %v358_v18 }
  0x86   : > { %v230_v9 = vpop.permute.xlu0 %229 }
  0x87   : > { %v237_v10 = vrot.slane %v230_v9, %v236_v8 }
  0x89   : > { %v239_v13 = vmul.f32 %v237_v10, %v225_v11 }
  0x8a   : > { %v244_v12 = vpop.permute.xlu0 %243 }
  0x8b   : > { %v251_v14 = vrot.slane %v244_v12, %v236_v8 }
  0x8d   : > { %v253_v15 = vadd.f32 %v251_v14, %v239_v13  ;;  %v376_v14 = vrot.slane %v719_v26, %v375_v56 }
  0x8f   : > { %v690_v16 = vmax.f32 %v253_v15, 0.0  ;;  %v380_v15 = vrot.slane %v724_v27, %v375_v56 }
  0x91   : > { %315 = vrot.lane.b32.xlu0 %v690_v16, %s628_s28  ;;  %281 = vrot.lane.b32.xlu1 %v690_v16, %s629_s29  ;;  %v696_v17 = vcombine.high %v690_v16, %v690_v16 }
  0x95   : > { %262 = vrot.lane.b32.xlu0 %v690_v16, %s630_s30  ;;  %283 = vrot.lane.b32.xlu1 %v696_v17, %s629_s29 }
  0x99   : > { %298 = vrot.lane.b32.xlu0 %v690_v16, %s631_s6  ;;  %317 = vrot.lane.b32.xlu1 %v696_v17, %s628_s28 }
  0x9d   : > { %332 = vrot.lane.b32.xlu0 %v690_v16, %s632_s7  ;;  %264 = vrot.lane.b32.xlu1 %v696_v17, %s630_s30 }
  0xa1   : > { %366 = vrot.lane.b32.xlu0 %v690_v16, %s633_s8  ;;  %300 = vrot.lane.b32.xlu1 %v696_v17, %s631_s6 }
  0xa5   : > { %349 = vrot.lane.b32.xlu0 %v690_v16, %s634_s9  ;;  %334 = vrot.lane.b32.xlu1 %v696_v17, %s632_s7 }
  0xa9   : > { %383 = vrot.lane.b32.xlu0 %v690_v16, %s635_s10  ;;  %368 = vrot.lane.b32.xlu1 %v696_v17, %s633_s8 }
  0xad   : > { %351 = vrot.lane.b32.xlu1 %v696_v17, %s634_s9 }
  0xb1   : > { %385 = vrot.lane.b32.xlu1 %v696_v17, %s635_s10 }
 0x103   : > { %v316_v19 = vpop.permute.xlu0 %315  ;;  %v282_v20 = vpop.permute.xlu1 %281 }
 0x107   : > { %v263_v22 = vpop.permute.xlu0 %262  ;;  %v284_v23 = vpop.permute.xlu1 %283 }
 0x108   : > { %v286_v35 = vsel %vm285_vm0, %v282_v20, %v284_v23  ;;  %v287_v36 = vsel %vm285_vm0, %v284_v23, %v282_v20 }
 0x109   : > { %v296_v43 = vmul.f32 %v291_v31, %v287_v36  ;;  %v297_v44 = vmul.f32 %v295_v32, %v286_v35  ;;  %v363_v31 = vrot.slane %v724_v27, %v358_v18 }
 0x10b   : > { %v299_v28 = vpop.permute.xlu0 %298  ;;  %v318_v29 = vpop.permute.xlu1 %317  ;;  %v402_v57 = vrot.slane %v296_v43, 4  ;;  %v403_v58 = vrot.slane %v297_v44, 4 }
 0x10c   : > { %v320_v38 = vsel %vm319_vm1, %v316_v19, %v318_v29  ;;  %v321_v39 = vsel %vm319_vm1, %v318_v29, %v316_v19 }
 0x10d   : > { %v330_v47 = vmul.f32 %v325_v33, %v321_v39  ;;  %v331_v48 = vmul.f32 %v329_v34, %v320_v38 }
 0x10f   : > { %v265_v42 = vpop.permute.xlu1 %264  ;;  %v333_v49 = vpop.permute.xlu0 %332  ;;  %v408_v61 = vrot.slane %v330_v47, 4  ;;  %v409_v62 = vrot.slane %v331_v48, 4 }
 0x110   : > { %v269_v45 = vsel %vm268_vm2, %v263_v22, %v265_v42  ;;  %v270_v46 = vsel %vm268_vm2, %v265_v42, %v263_v22 }
 0x111   : > { %v279_v53 = vmul.f32 %v274_v40, %v270_v46  ;;  %v280_v54 = vmul.f32 %v278_v41, %v269_v45  ;;  %v582_v40 = vld [vmem:[%s797_s4 + $0x18] ss:$0 sm:$0xff] }
 0x113   : > { %v301_v55 = vpop.permute.xlu1 %300  ;;  %v367_v3 = vpop.permute.xlu0 %366  ;;  %v426_v5 = vsel %vm424_vm4, %v280_v54, %v403_v58  ;;  %v425_v8 = vsel %vm424_vm4, %v279_v53, %v402_v57 }
 0x114   : > { %v303_v59 = vsel %vm302_vm3, %v299_v28, %v301_v55  ;;  %v304_v60 = vsel %vm302_vm3, %v301_v55, %v299_v28 }
 0x115   : > { %v313_v63 = vmul.f32 %v308_v50, %v304_v60  ;;  %v314_v0 = vmul.f32 %v312_v51, %v303_v59  ;;  %v433_v50 = vld [vmem:[%s796_s3] sm:$0xff] }
 0x117   : > { %v335_v4 = vpop.permute.xlu1 %334  ;;  %v428_v6 = vsel %vm424_vm4, %v314_v0, %v409_v62  ;;  %v427_v9 = vsel %vm424_vm4, %v313_v63, %v408_v61  ;;  %v350_v25 = vpop.permute.xlu0 %349 }
 0x118   : > { %v337_v10 = vsel %vm336_vm5, %v333_v49, %v335_v4  ;;  %v338_v11 = vsel %vm336_vm5, %v335_v4, %v333_v49  ;;  %v590_v12 = vpack.c.bf16 %v428_v6, %v426_v5  ;;  %v592_v13 = vpack.c.bf16 %v427_v9, %v425_v8  ;;  %v581_v49 = vld [vmem:[%s797_s4 + $0x10] ss:$0 sm:$0xff] }
 0x119   : > { %v347_v19 = vmul.f32 %v342_v1, %v337_v10  ;;  %v348_v20 = vmul.f32 %v346_v2, %v338_v11 }
 0x11a   : > { %591 = vmatprep.subr.bf16.mxu0 %v590_v12 }
 0x11b   : > { %593 = vmatpush1.bf16.msra.mxu0 %v592_v13  ;;  %v369_v22 = vpop.permute.xlu1 %368  ;;  %v414_v32 = vrot.slane %v347_v19, 4  ;;  %v415_v33 = vrot.slane %v348_v20, 4  ;;  %v384_v41 = vpop.permute.xlu0 %383 }
 0x11c   : > { %v371_v23 = vsel %vm370_vm6, %v367_v3, %v369_v22  ;;  %v372_v24 = vsel %vm370_vm6, %v369_v22, %v367_v3 }
 0x11d   : > { %v381_v28 = vmul.f32 %v376_v14, %v371_v23  ;;  %v382_v29 = vmul.f32 %v380_v15, %v372_v24  ;;  %v430_v26 = vsel %vm424_vm4, %v696_v17, %v415_v33  ;;  %v429_v43 = vsel %vm424_vm4, %v690_v16, %v414_v32 }
 0x11f   : > { %v352_v34 = vpop.permute.xlu1 %351  ;;  %v420_v36 = vrot.slane %v381_v28, 4  ;;  %v421_v37 = vrot.slane %v382_v29, 4 }
 0x120   : > { %v354_v7 = vsel %vm353_vm7, %v350_v25, %v352_v34  ;;  %v355_v35 = vsel %vm353_vm7, %v352_v34, %v350_v25 }
 0x121   : > { %v364_v38 = vmul.f32 %v359_v30, %v354_v7  ;;  %v365_v39 = vmul.f32 %v363_v31, %v355_v35 }
 0x123   : > { %v386_v42 = vpop.permute.xlu1 %385  ;;  %v432_v27 = vsel %vm424_vm4, %v365_v39, %v421_v37  ;;  %v431_v44 = vsel %vm424_vm4, %v364_v38, %v420_v36 }
 0x124   : > { %v389_v45 = vsel %vm387_vm8, %v386_v42, %v384_v41  ;;  %v594_v46 = vpack.c.bf16 %v432_v27, %v430_v26  ;;  %v596_v47 = vpack.c.bf16 %v431_v44, %v429_v43  ;;  %v388_v17 = vsel %vm387_vm8, %v384_v41, %v386_v42 }
 0x125   : > { %v399_v48 = vmul.f32 %v582_v40, %v389_v45  ;;  %v398_v16 = vmul.f32 %v581_v49, %v388_v17 }
 0x126   : > { %595 = vmatprep.subr.bf16.mxu0 %v594_v46 }
 0x127   : > { %597 = vmatpush1.bf16.msra.mxu0 %v596_v47 }
 0x128   : > { %583 = vmatprep.subr.msk.mxu0 %vm424_vm4, %v399_v48 }
 0x12b   : > { %584 = vmatpush1.msk.msra.mxu0 %vm424_vm4, %v398_v16 }
 0x12c   : > { %585 = vmatmul.mubr.msk.f32.vlgmr.msra.gmra.mrb[0].mxu0 %vm434_vm9, %v433_v50 }
 0x1ff   : > { %v510_v21 = vpop.f32.mrb[0].mxu0 }
 0x200   : > { %515 = vst [vmem:[%s224_s26] sm:$0xff] %v510_v21  ;;  %v512_v51 = vpop.f32.mrb[1].mxu0 }
 0x201   : > { %516 = vst [vmem:[%s224_s26 + $0x8] sm:$0xff] %v512_v51 }
 0x202 PF: > { %s15_s18 = sadd.s32 1, %s624_s18  }
 0x203   : > { %p12_p4 = scmp.ge.s32.totalorder %s15_s18, 4  }
 0x205   :  { %14 = sbr.rel (!%p12_p4) target bundleno = 1 (0x1), region = 70 }

</bundles_post_ra>
